<compile_context>
chip_gen: v7x
topology: tpu7x:2x2x1
jax: 0.10.0
libtpu: 0.0.40
codegen_flags: <defaults>
</compile_context>

<pallas_src>
import functools

import jax
import jax.numpy as jnp
from jax.experimental import pallas as pl
from jax.experimental.pallas import tpu as pltpu


_UNROLL_K = 8          # static-unroll threshold for the adjacency build


def _ceil_to(x, m):
    return ((x + m - 1) // m) * m


def _vmem_capacity_bytes():
    """Physical VMEM of the local TPU generation (fallback: 128 MiB)."""
    try:
        cap = getattr(pltpu.get_tpu_info(), "vmem_capacity_bytes", None)
        if cap:
            return int(cap)
    except Exception:
        pass
    return 128 << 20


def _invariant_spec(shape):
    """BlockSpec for a grid-invariant operand; single-buffered when supported."""
    index_map = lambda b: (0,) * len(shape)
    if hasattr(pl, "Buffered"):
        try:
            return pl.BlockSpec(shape, index_map, pipeline_mode=pl.Buffered(1))
        except TypeError:
            pass
    return pl.BlockSpec(shape, index_map)


def _topgnn_kernel(x_ref, idx_ref, pool_ref, wt_ref, wfc_ref, pp_ref, eta_ref,
                   o_ref):
    """Processes one block of batch elements (one grid step).

    x_ref:    (Bblk*S, D)  hidden states, flattened over the block (bf16)
    idx_ref:  (Bblk, S, k) int32 top-k source indices (-1 = dropped/padded edge)
    pool_ref: (Bblk, 1, S) f32 pooling weights (valid-mask / length)
    wt_ref:   (D, P)       node_trans weight (bf16)
    wfc_ref:  (P, P)       fc weight (f32)
    pp_ref:   (4, P)       packed [b_trans, b_fc, ln_gamma, ln_beta] (f32)
    eta_ref:  (1,)         node_eta scalar in SMEM
    o_ref:    (Bblk, P)    output block (lane-dense)
    """
    Bblk, S, k = idx_ref.shape
    P = wt_ref.shape[1]
    cdt = wt_ref.dtype                          # MXU compute dtype (bf16)

    # ---- node_trans: one (Bblk*S, D) @ (D, P) MXU matmul -------------------
    h0 = jnp.dot(x_ref[...], wt_ref[...], preferred_element_type=jnp.float32)
    h0 = (h0 + pp_ref[0:1, :]).reshape(Bblk, S, P)          # + b_trans (f32)

    # ---- densify the top-k graph as a 0/1 adjacency in the MXU dtype -------
    # Sentinel index -1 never matches a column, so dropped / padded edges
    # simply contribute nothing; no per-edge f32 weights are needed.
    cols = jax.lax.broadcasted_iota(jnp.int32, (1, 1, S), 2)

    def add_edges(j, adj):
        idx_j = idx_ref[:, :, pl.ds(j, 1)]                  # (Bblk, S, 1)
        return adj + (idx_j == cols).astype(cdt)            # 0/1 accumulate

    adj = jnp.zeros((Bblk, S, S), cdt)
    if k <= _UNROLL_K:
        for j in range(k):                                  # static lane slices
            adj = add_edges(j, adj)
    else:
        # TODO(synk): rolled path relies on a dynamic minor-dim slice of the
        # index tile; switch to a (B, k, S) layout + transposed build if a
        # future Mosaic version rejects it.
        adj = jax.lax.fori_loop(0, k, add_edges, adj)

    # In-degree per target row from the compact indices (cheap lane reduce).
    deg = jnp.sum((idx_ref[...] >= 0).astype(jnp.float32), axis=-1,
                  keepdims=True)                            # (Bblk, S, 1)

    # ---- 'mean' message passing: after = A @ h0 (batched MXU matmul) -------
    after = jnp.einsum("bts,bsp->btp", adj, h0.astype(cdt),
                       preferred_element_type=jnp.float32)

    # eta mix with the 1/deg normalization folded in.  Rows with zero
    # in-degree keep h0 unchanged (DGL's update_all never touches them).
    eta = eta_ref[0]
    has_in = deg > 0.0
    base = jnp.where(has_in, eta, 1.0)                      # (Bblk, S, 1)
    scale = jnp.where(has_in, (1.0 - eta) / jnp.maximum(deg, 1.0), 0.0)
    new_h = base * h0 + scale * after                       # f32 elementwise

    # ---- dgl.mean_nodes: masked mean pool as a batched matvec --------------
    pooled = jnp.einsum("bqs,bsp->bqp", pool_ref[...], new_h,
                        preferred_element_type=jnp.float32)[:, 0, :]

    # ---- tanh -> dropout (identity, eval) -> fc -> LayerNorm ----------------
    act = jnp.tanh(pooled)
    fc = jnp.dot(act, wfc_ref[...], preferred_element_type=jnp.float32)
    fc = fc + pp_ref[1:2, :]
    mu = jnp.mean(fc, axis=-1, keepdims=True)
    var = jnp.mean(jnp.square(fc - mu), axis=-1, keepdims=True)
    normed = (fc - mu) * jax.lax.rsqrt(var + 1e-5)
    o_ref[...] = normed * pp_ref[2:3, :] + pp_ref[3:4, :]


@functools.partial(jax.jit, static_argnames=("top_rate", "mxu_dtype"))
def topgnn_forward(hidden_state, attention, lengths, params, top_rate=0.1,
                   mxu_dtype=jnp.bfloat16):
    """Full forward.  Graph construction stays in plain JAX but only produces
    the compact (B,S,k) sentinel-masked top-k indices; all matmuls,
    aggregation, pooling, MLP and LayerNorm run inside the Pallas kernel."""
    B, S, D = hidden_state.shape
    P = params["w_trans"].shape[1]
    k = max(1, min(S, round(top_rate * S)))

    # ---------------- host-side graph construction (compact form) ----------
    avg_atten = jnp.mean(attention, axis=1)                        # (B,S,S)
    topk_vals, topk_idx = jax.lax.top_k(avg_atten, k)              # (B,S,k)
    topk_idx = topk_idx.astype(jnp.int32)

    # Keep iff value > 0, unless the whole row is <= 0 (uniform softmax).
    pos = topk_vals > 0.0
    any_pos = jnp.any(pos, axis=-1, keepdims=True)
    keep = jnp.where(any_pos, pos, True)                           # (B,S,k)

    # Only nodes < lengths[b] exist in the DGL graph: mask target rows AND
    # source columns (padded positions never contribute messages).
    row_valid = jnp.arange(S)[None, :, None] < lengths[:, None, None]
    src_valid = topk_idx < lengths[:, None, None]
    keep = jnp.logical_and(jnp.logical_and(keep, row_valid), src_valid)

    # Dropped / padded edges -> sentinel index -1; the kernel rebuilds the
    # 0/1 adjacency and derives the 1/deg 'mean' weights itself.
    idx_sent = jnp.where(keep, topk_idx, -1)                       # (B,S,k)

    # dgl.mean_nodes -> per-graph mask/length pooling weights (batched matvec).
    eff_len = jnp.minimum(lengths, S).astype(jnp.float32)
    node_valid = (jnp.arange(S)[None, :] < lengths[:, None]).astype(jnp.float32)
    pool_w = (node_valid / jnp.maximum(eff_len, 1.0)[:, None])[:, None, :]

    # ---------------- pad S to a sublane multiple (layout-preserving) -------
    S_pad = _ceil_to(S, 8)
    if S_pad != S:
        hidden_state = jnp.pad(hidden_state, ((0, 0), (0, S_pad - S), (0, 0)))
        idx_sent = jnp.pad(idx_sent, ((0, 0), (0, S_pad - S), (0, 0)),
                           constant_values=-1)
        pool_w = jnp.pad(pool_w, ((0, 0), (0, 0), (0, S_pad - S)))

    # ---------------- generation-aware batch blocking & VMEM budget ---------
    lane, sub = 128, 8
    cb = jnp.dtype(mxu_dtype).itemsize
    D_l, P_l, S_l, k_l = (_ceil_to(v, lane) for v in (D, P, S_pad, k))
    per_b = (2 * S_pad * D_l * cb          # hidden block (double-buffered)
             + 2 * S_pad * k_l * 4         # top-k index block
             + 2 * sub * S_l * 4           # pooling-weight block
             + S_pad * P_l * (4 + cb)      # h0 (f32) + its bf16 MXU copy
             + S_pad * S_l * cb            # dense adjacency (bf16)
             + 2 * S_pad * P_l * 4)        # after + new_h (f32)
    fixed = (_ceil_to(D, sub) * P_l * cb   # W_trans   (single-buffered)
             + _ceil_to(P, sub) * P_l * 4  # W_fc
             + sub * P_l * 4               # packed (4,P) params
             + 2 * sub * P_l * 4           # output block
             + (2 << 20))                  # Mosaic internal scratch / slack
    cap = _vmem_capacity_bytes()
    budget = (cap * 3) // 4                # ~48 MiB on v7x, ~96 MiB on v5e/v6e
    max_bblk = max(1, (budget - fixed) // per_b)

    if B <= 8:
        Bblk = B                           # single step; blocks == full arrays
    else:
        Bblk = max(8, (min(max_bblk, B, 32) // 8) * 8)
        # keep >= 2 grid steps so both v7x TensorCores get work
        Bblk = min(Bblk, max(8, 8 * ((B + 15) // 16)))
    nb = -(-B // Bblk)
    B_pad = nb * Bblk
    if B_pad != B:
        hidden_state = jnp.pad(hidden_state, ((0, B_pad - B), (0, 0), (0, 0)))
        idx_sent = jnp.pad(idx_sent, ((0, B_pad - B), (0, 0), (0, 0)),
                           constant_values=-1)
        pool_w = jnp.pad(pool_w, ((0, B_pad - B), (0, 0), (0, 0)))

    x_flat = hidden_state.astype(mxu_dtype).reshape(B_pad * S_pad, D)
    w_trans = params["w_trans"].astype(mxu_dtype)
    w_fc = params["w_fc"].astype(jnp.float32)
    packed = jnp.concatenate(
        [params["b_trans"], params["b_fc"],
         params["ln_gamma"], params["ln_beta"]], axis=0).astype(jnp.float32)
    eta = params["eta"].reshape(1).astype(jnp.float32)

    vmem_limit = int(min(max(fixed + Bblk * per_b + (4 << 20), 32 << 20),
                         (cap * 9) // 10))

    cost = pl.CostEstimate(
        flops=int(2 * B_pad * S_pad * (D * P + S_pad * P + S_pad * k + P)
                  + 2 * B_pad * P * P),
        transcendentals=int(B_pad * P),
        bytes_accessed=int(B_pad * S_pad * (D * cb + k * 4 + 4)
                           + D * P * cb + P * P * 4 + 4 * P * 4
                           + B_pad * P * 4))

    out = pl.pallas_call(
        _topgnn_kernel,
        out_shape=jax.ShapeDtypeStruct((B_pad, P), jnp.float32),
        grid=(nb,),
        in_specs=[
            pl.BlockSpec((Bblk * S_pad, D), lambda b: (b, 0)),    # hidden (flat)
            pl.BlockSpec((Bblk, S_pad, k), lambda b: (b, 0, 0)),  # top-k indices
            pl.BlockSpec((Bblk, 1, S_pad), lambda b: (b, 0, 0)),  # pool weights
            _invariant_spec((D, P)),                              # W_trans
            _invariant_spec((P, P)),                              # W_fc
            _invariant_spec((4, P)),                              # packed params
            pl.BlockSpec(memory_space=pltpu.MemorySpace.SMEM),    # eta scalar
        ],
        out_specs=pl.BlockSpec((Bblk, P), lambda b: (b, 0)),
        compiler_params=pltpu.CompilerParams(
            dimension_semantics=("parallel",),
            vmem_limit_bytes=vmem_limit),
        cost_estimate=cost,
    )(x_flat, idx_sent, pool_w, w_trans, w_fc, packed, eta)

    return out[:B]


def init_params(key, dim_model, predict_dim):
    k1, k2, k3, k4 = jax.random.split(key, 4)
    scale_t = 1.0 / jnp.sqrt(dim_model)
    scale_f = 1.0 / jnp.sqrt(predict_dim)
    return {
        "w_trans": (jax.random.normal(k1, (dim_model, predict_dim),
                                      jnp.float32) * scale_t),
        "b_trans": (jax.random.normal(k2, (1, predict_dim),
                                      jnp.float32) * scale_t),
        "w_fc": (jax.random.normal(k3, (predict_dim, predict_dim),
                                   jnp.float32) * scale_f),
        "b_fc": (jax.random.normal(k4, (1, predict_dim),
                                   jnp.float32) * scale_f),
        "ln_gamma": jnp.ones((1, predict_dim), jnp.float32),
        "ln_beta": jnp.zeros((1, predict_dim), jnp.float32),
        # node_eta is filled with 0 in the PyTorch __init__
        "eta": jnp.zeros((1, 1), jnp.float32),
    }


if __name__ == "__main__":
    B, H, S = 2, 4, 16          # batch, attention heads, sequence length
    dim_model, predict_dim = 32, 16
    top_rate = 0.25             # k = round(0.25 * 16) = 4 top edges per node

    key = jax.random.PRNGKey(0)
    k_param, k_hidden, k_attn = jax.random.split(key, 3)

    params = init_params(k_param, dim_model, predict_dim)
    hidden_state = jax.random.normal(k_hidden, (B, S, dim_model), jnp.float32)
    attention = jax.random.normal(k_attn, (B, H, S, S), jnp.float32)
    lengths = jnp.array([S, S - 3], dtype=jnp.int32)   # exercise length masking

    out = topgnn_forward(hidden_state, attention, lengths, params,
                         top_rate=top_rate)
    jax.block_until_ready(out)
    assert out.shape == (B, predict_dim)
    assert jnp.all(jnp.isfinite(out))
    print("KERNEL_OK")
</pallas_src>

<mosaic_0001>
module attributes {stable_mosaic.version = 11 : i64} {
  func.func @_topgnn_kernel(%arg0: i32, %arg1: memref<32x32xbf16, #tpu.memory_space<vmem>>, %arg2: memref<2x16x4xi32, #tpu.memory_space<vmem>>, %arg3: memref<2x1x16xf32, #tpu.memory_space<vmem>>, %arg4: memref<32x16xbf16, #tpu.memory_space<vmem>>, %arg5: memref<16x16xf32, #tpu.memory_space<vmem>>, %arg6: memref<4x16xf32, #tpu.memory_space<vmem>>, %arg7: memref<1xf32, #tpu.memory_space<smem>>, %arg8: memref<2x16xf32, #tpu.memory_space<vmem>>) attributes {dimension_semantics = [#tpu.dimension_semantics<parallel>], iteration_bounds = array<i64: 1>, scalar_prefetch = 0 : i64, scratch_operands = 0 : i64, tpu.core_type = #tpu.core_type<tc>, window_params = [{transform_indices = @transform_0, window_bounds = array<i64: 32, 32>}, {transform_indices = @transform_1, window_bounds = array<i64: 2, 16, 4>}, {transform_indices = @transform_2, window_bounds = array<i64: 2, 1, 16>}, {pipeline_mode = #tpu.pipeline_mode<synchronous>, transform_indices = @transform_3, window_bounds = array<i64: 32, 16>}, {pipeline_mode = #tpu.pipeline_mode<synchronous>, transform_indices = @transform_4, window_bounds = array<i64: 16, 16>}, {pipeline_mode = #tpu.pipeline_mode<synchronous>, transform_indices = @transform_5, window_bounds = array<i64: 4, 16>}, {transform_indices = @transform_6, window_bounds = array<i64: 1>}, {transform_indices = @transform_7, window_bounds = array<i64: 2, 16>}]} {
    %c0 = arith.constant 0 : index
    %c0_0 = arith.constant 0 : index
    %0 = vector.load %arg1[%c0, %c0_0] : memref<32x32xbf16, #tpu.memory_space<vmem>>, vector<32x32xbf16>
    %c0_1 = arith.constant 0 : index
    %c0_2 = arith.constant 0 : index
    %1 = vector.load %arg4[%c0_1, %c0_2] : memref<32x16xbf16, #tpu.memory_space<vmem>>, vector<32x16xbf16>
    %cst = arith.constant dense<0.000000e+00> : vector<32x16xf32>
    %2 = tpu.matmul %0, %1, %cst {dimension_numbers = #tpu.dot_dimension_numbers<[1], [0], [0], [1], [0, 0, 1, 1], [], []>} : vector<32x32xbf16>, vector<32x16xbf16>, vector<32x16xf32> -> vector<32x16xf32>
    %c0_3 = arith.constant 0 : index
    %c0_4 = arith.constant 0 : index
    %3 = vector.load %arg6[%c0_3, %c0_4] : memref<4x16xf32, #tpu.memory_space<vmem>>, vector<1x16xf32>
    %4 = vector.broadcast %3 : vector<1x16xf32> to vector<32x16xf32>
    %5 = arith.addf %2, %4 : vector<32x16xf32>
    %6 = vector.shape_cast %5 : vector<32x16xf32> to vector<2x16x16xf32>
    %7 = tpu.iota {dimensions = array<i32: 2>} : vector<1x1x16xi32>
    %cst_5 = arith.constant 0.000000e+00 : bf16
    %8 = vector.broadcast %cst_5 : bf16 to vector<2x16x16xbf16>
    %c0_6 = arith.constant 0 : index
    %c0_7 = arith.constant 0 : index
    %c0_8 = arith.constant 0 : index
    %9 = vector.load %arg2[%c0_6, %c0_7, %c0_8] : memref<2x16x4xi32, #tpu.memory_space<vmem>>, vector<2x16x1xi32>
    %10 = vector.broadcast %9 : vector<2x16x1xi32> to vector<2x16x16xi32>
    %11 = vector.broadcast %7 : vector<1x1x16xi32> to vector<2x16x16xi32>
    %12 = arith.cmpi eq, %10, %11 : vector<2x16x16xi32>
    %13 = arith.extui %12 : vector<2x16x16xi1> to vector<2x16x16xi32>
    %14 = arith.sitofp %13 : vector<2x16x16xi32> to vector<2x16x16xf32>
    %15 = arith.truncf %14 : vector<2x16x16xf32> to vector<2x16x16xbf16>
    %16 = arith.addf %8, %15 : vector<2x16x16xbf16>
    %c0_9 = arith.constant 0 : index
    %c0_10 = arith.constant 0 : index
    %c1 = arith.constant 1 : index
    %17 = vector.load %arg2[%c0_9, %c0_10, %c1] : memref<2x16x4xi32, #tpu.memory_space<vmem>>, vector<2x16x1xi32>
    %18 = vector.broadcast %17 : vector<2x16x1xi32> to vector<2x16x16xi32>
    %19 = vector.broadcast %7 : vector<1x1x16xi32> to vector<2x16x16xi32>
    %20 = arith.cmpi eq, %18, %19 : vector<2x16x16xi32>
    %21 = arith.extui %20 : vector<2x16x16xi1> to vector<2x16x16xi32>
    %22 = arith.sitofp %21 : vector<2x16x16xi32> to vector<2x16x16xf32>
    %23 = arith.truncf %22 : vector<2x16x16xf32> to vector<2x16x16xbf16>
    %24 = arith.addf %16, %23 : vector<2x16x16xbf16>
    %c0_11 = arith.constant 0 : index
    %c0_12 = arith.constant 0 : index
    %c2 = arith.constant 2 : index
    %25 = vector.load %arg2[%c0_11, %c0_12, %c2] : memref<2x16x4xi32, #tpu.memory_space<vmem>>, vector<2x16x1xi32>
    %26 = vector.broadcast %25 : vector<2x16x1xi32> to vector<2x16x16xi32>
    %27 = vector.broadcast %7 : vector<1x1x16xi32> to vector<2x16x16xi32>
    %28 = arith.cmpi eq, %26, %27 : vector<2x16x16xi32>
    %29 = arith.extui %28 : vector<2x16x16xi1> to vector<2x16x16xi32>
    %30 = arith.sitofp %29 : vector<2x16x16xi32> to vector<2x16x16xf32>
    %31 = arith.truncf %30 : vector<2x16x16xf32> to vector<2x16x16xbf16>
    %32 = arith.addf %24, %31 : vector<2x16x16xbf16>
    %c0_13 = arith.constant 0 : index
    %c0_14 = arith.constant 0 : index
    %c3 = arith.constant 3 : index
    %33 = vector.load %arg2[%c0_13, %c0_14, %c3] : memref<2x16x4xi32, #tpu.memory_space<vmem>>, vector<2x16x1xi32>
    %34 = vector.broadcast %33 : vector<2x16x1xi32> to vector<2x16x16xi32>
    %35 = vector.broadcast %7 : vector<1x1x16xi32> to vector<2x16x16xi32>
    %36 = arith.cmpi eq, %34, %35 : vector<2x16x16xi32>
    %37 = arith.extui %36 : vector<2x16x16xi1> to vector<2x16x16xi32>
    %38 = arith.sitofp %37 : vector<2x16x16xi32> to vector<2x16x16xf32>
    %39 = arith.truncf %38 : vector<2x16x16xf32> to vector<2x16x16xbf16>
    %40 = arith.addf %32, %39 : vector<2x16x16xbf16>
    %c0_15 = arith.constant 0 : index
    %c0_16 = arith.constant 0 : index
    %c0_17 = arith.constant 0 : index
    %41 = vector.load %arg2[%c0_15, %c0_16, %c0_17] : memref<2x16x4xi32, #tpu.memory_space<vmem>>, vector<2x16x4xi32>
    %c0_i32 = arith.constant 0 : i32
    %42 = vector.broadcast %c0_i32 : i32 to vector<2x16x4xi32>
    %43 = arith.cmpi sge, %41, %42 : vector<2x16x4xi32>
    %44 = arith.extui %43 : vector<2x16x4xi1> to vector<2x16x4xi32>
    %45 = arith.sitofp %44 : vector<2x16x4xi32> to vector<2x16x4xf32>
    %cst_18 = arith.constant dense<0.000000e+00> : vector<2x16xf32>
    %46 = vector.multi_reduction <add>, %45, %cst_18 [2] : vector<2x16x4xf32> to vector<2x16xf32>
    %47 = vector.shape_cast %46 : vector<2x16xf32> to vector<2x16x1xf32>
    %48 = arith.truncf %6 : vector<2x16x16xf32> to vector<2x16x16xbf16>
    "tpu.trace_start"() <{level = 10 : i32, message = "bts,bsp->btp"}> : () -> ()
    %cst_19 = arith.constant dense<0.000000e+00> : vector<2x16x16xf32>
    %49 = tpu.matmul %40, %48, %cst_19 {dimension_numbers = #tpu.dot_dimension_numbers<[2], [1], [1], [2], [0, 0, 0, 1, 1, 2], [0], [0]>} : vector<2x16x16xbf16>, vector<2x16x16xbf16>, vector<2x16x16xf32> -> vector<2x16x16xf32>
    "tpu.trace_stop"() : () -> ()
    %c0_20 = arith.constant 0 : index
    %50 = memref.load %arg7[%c0_20] : memref<1xf32, #tpu.memory_space<smem>>
    %cst_21 = arith.constant 0.000000e+00 : f32
    %51 = vector.broadcast %cst_21 : f32 to vector<2x16x1xf32>
    %52 = arith.cmpf ogt, %47, %51 : vector<2x16x1xf32>
    %cst_22 = arith.constant 1.000000e+00 : f32
    %53 = vector.broadcast %50 : f32 to vector<2x16x1xf32>
    %54 = vector.broadcast %cst_22 : f32 to vector<2x16x1xf32>
    %55 = arith.select %52, %53, %54 : vector<2x16x1xi1>, vector<2x16x1xf32>
    %cst_23 = arith.constant 1.000000e+00 : f32
    %56 = arith.subf %cst_23, %50 : f32
    %cst_24 = arith.constant 1.000000e+00 : f32
    %57 = vector.broadcast %cst_24 : f32 to vector<2x16x1xf32>
    %58 = arith.maximumf %47, %57 : vector<2x16x1xf32>
    %59 = vector.broadcast %56 : f32 to vector<2x16x1xf32>
    %60 = arith.divf %59, %58 : vector<2x16x1xf32>
    %cst_25 = arith.constant 0.000000e+00 : f32
    %61 = vector.broadcast %cst_25 : f32 to vector<2x16x1xf32>
    %62 = arith.select %52, %60, %61 : vector<2x16x1xi1>, vector<2x16x1xf32>
    %63 = vector.broadcast %55 : vector<2x16x1xf32> to vector<2x16x16xf32>
    %64 = arith.mulf %63, %6 : vector<2x16x16xf32>
    %65 = vector.broadcast %62 : vector<2x16x1xf32> to vector<2x16x16xf32>
    %66 = arith.mulf %65, %49 : vector<2x16x16xf32>
    %67 = arith.addf %64, %66 : vector<2x16x16xf32>
    %c0_26 = arith.constant 0 : index
    %c0_27 = arith.constant 0 : index
    %c0_28 = arith.constant 0 : index
    %68 = vector.load %arg3[%c0_26, %c0_27, %c0_28] : memref<2x1x16xf32, #tpu.memory_space<vmem>>, vector<2x1x16xf32>
    "tpu.trace_start"() <{level = 10 : i32, message = "bqs,bsp->bqp"}> : () -> ()
    %cst_29 = arith.constant dense<0.000000e+00> : vector<2x1x16xf32>
    %69 = tpu.matmul %68, %67, %cst_29 {dimension_numbers = #tpu.dot_dimension_numbers<[2], [1], [1], [2], [0, 0, 0, 1, 1, 2], [0], [0]>} : vector<2x1x16xf32>, vector<2x16x16xf32>, vector<2x1x16xf32> -> vector<2x1x16xf32>
    "tpu.trace_stop"() : () -> ()
    %70 = vector.shape_cast %69 : vector<2x1x16xf32> to vector<2x16xf32>
    %71 = math.tanh %70 : vector<2x16xf32>
    %c0_30 = arith.constant 0 : index
    %c0_31 = arith.constant 0 : index
    %72 = vector.load %arg5[%c0_30, %c0_31] : memref<16x16xf32, #tpu.memory_space<vmem>>, vector<16x16xf32>
    %cst_32 = arith.constant dense<0.000000e+00> : vector<2x16xf32>
    %73 = tpu.matmul %71, %72, %cst_32 {dimension_numbers = #tpu.dot_dimension_numbers<[1], [0], [0], [1], [0, 0, 1, 1], [], []>} : vector<2x16xf32>, vector<16x16xf32>, vector<2x16xf32> -> vector<2x16xf32>
    %c1_33 = arith.constant 1 : index
    %c0_34 = arith.constant 0 : index
    %74 = vector.load %arg6[%c1_33, %c0_34] : memref<4x16xf32, #tpu.memory_space<vmem>>, vector<1x16xf32>
    %75 = vector.broadcast %74 : vector<1x16xf32> to vector<2x16xf32>
    %76 = arith.addf %73, %75 : vector<2x16xf32>
    %cst_35 = arith.constant dense<0.000000e+00> : vector<2xf32>
    %77 = vector.multi_reduction <add>, %76, %cst_35 [1] : vector<2x16xf32> to vector<2xf32>
    %78 = vector.shape_cast %77 : vector<2xf32> to vector<2x1xf32>
    %cst_36 = arith.constant 1.600000e+01 : f32
    %79 = vector.broadcast %cst_36 : f32 to vector<2x1xf32>
    %80 = arith.divf %78, %79 : vector<2x1xf32>
    %81 = vector.broadcast %80 : vector<2x1xf32> to vector<2x16xf32>
    %82 = arith.subf %76, %81 : vector<2x16xf32>
    %83 = arith.mulf %82, %82 : vector<2x16xf32>
    %cst_37 = arith.constant dense<0.000000e+00> : vector<2xf32>
    %84 = vector.multi_reduction <add>, %83, %cst_37 [1] : vector<2x16xf32> to vector<2xf32>
    %85 = vector.shape_cast %84 : vector<2xf32> to vector<2x1xf32>
    %cst_38 = arith.constant 1.600000e+01 : f32
    %86 = vector.broadcast %cst_38 : f32 to vector<2x1xf32>
    %87 = arith.divf %85, %86 : vector<2x1xf32>
    %88 = vector.broadcast %80 : vector<2x1xf32> to vector<2x16xf32>
    %89 = arith.subf %76, %88 : vector<2x16xf32>
    %cst_39 = arith.constant 9.99999974E-6 : f32
    %90 = vector.broadcast %cst_39 : f32 to vector<2x1xf32>
    %91 = arith.addf %87, %90 : vector<2x1xf32>
    %92 = math.rsqrt %91 : vector<2x1xf32>
    %93 = vector.broadcast %92 : vector<2x1xf32> to vector<2x16xf32>
    %94 = arith.mulf %89, %93 : vector<2x16xf32>
    %c2_40 = arith.constant 2 : index
    %c0_41 = arith.constant 0 : index
    %95 = vector.load %arg6[%c2_40, %c0_41] : memref<4x16xf32, #tpu.memory_space<vmem>>, vector<1x16xf32>
    %96 = vector.broadcast %95 : vector<1x16xf32> to vector<2x16xf32>
    %97 = arith.mulf %94, %96 : vector<2x16xf32>
    %c3_42 = arith.constant 3 : index
    %c0_43 = arith.constant 0 : index
    %98 = vector.load %arg6[%c3_42, %c0_43] : memref<4x16xf32, #tpu.memory_space<vmem>>, vector<1x16xf32>
    %99 = vector.broadcast %98 : vector<1x16xf32> to vector<2x16xf32>
    %100 = arith.addf %97, %99 : vector<2x16xf32>
    %c0_44 = arith.constant 0 : index
    %c0_45 = arith.constant 0 : index
    %101 = vector.load %arg8[%c0_44, %c0_45] : memref<2x16xf32, #tpu.memory_space<vmem>>, vector<2x16xf32>
    tpu.vector_store %arg8[%c0_44, %c0_45], %100 {strides = array<i32>} : memref<2x16xf32, #tpu.memory_space<vmem>>, vector<2x16xf32>,
    return
  }
  func.func @transform_0(%arg0: i32) -> (i32, i32) {
    %c0_i32 = arith.constant 0 : i32
    %c0_i32_0 = arith.constant 0 : i32
    return %arg0, %c0_i32 : i32, i32
  }
  func.func @transform_1(%arg0: i32) -> (i32, i32, i32) {
    %c0_i32 = arith.constant 0 : i32
    %c0_i32_0 = arith.constant 0 : i32
    %c0_i32_1 = arith.constant 0 : i32
    return %arg0, %c0_i32, %c0_i32_0 : i32, i32, i32
  }
  func.func @transform_2(%arg0: i32) -> (i32, i32, i32) {
    %c0_i32 = arith.constant 0 : i32
    %c0_i32_0 = arith.constant 0 : i32
    %c0_i32_1 = arith.constant 0 : i32
    return %arg0, %c0_i32, %c0_i32_0 : i32, i32, i32
  }
  func.func @transform_3(%arg0: i32) -> (i32, i32) {
    %c0_i32 = arith.constant 0 : i32
    %c0_i32_0 = arith.constant 0 : i32
    %c0_i32_1 = arith.constant 0 : i32
    return %c0_i32, %c0_i32_0 : i32, i32
  }
  func.func @transform_4(%arg0: i32) -> (i32, i32) {
    %c0_i32 = arith.constant 0 : i32
    %c0_i32_0 = arith.constant 0 : i32
    %c0_i32_1 = arith.constant 0 : i32
    return %c0_i32, %c0_i32_0 : i32, i32
  }
  func.func @transform_5(%arg0: i32) -> (i32, i32) {
    %c0_i32 = arith.constant 0 : i32
    %c0_i32_0 = arith.constant 0 : i32
    %c0_i32_1 = arith.constant 0 : i32
    return %c0_i32, %c0_i32_0 : i32, i32
  }
  func.func @transform_6(%arg0: i32) -> i32 {
    %c0_i32 = arith.constant 0 : i32
    %c0_i32_0 = arith.constant 0 : i32
    return %c0_i32 : i32
  }
  func.func @transform_7(%arg0: i32) -> (i32, i32) {
    %c0_i32 = arith.constant 0 : i32
    %c0_i32_0 = arith.constant 0 : i32
    return %arg0, %c0_i32 : i32, i32
  }
}

</mosaic_0001>

<bundles_post_ra>
// kernel: topgnn_forward.1
= control target key start
LH: loop header
LB: loop body
LE: loop exit
PB: predicated region body
PF: predicated region fallthrough
CT: control target
= control target key end

     0   :  { %v835_v1 = vmov 1   ;;  %vm64_vm0 = vcmask 261120   ;;  %v836_v6 = vmov 0   ;;  %v837_v7 = vmov 0.0   ;;  %s1015_s0 = inlined_call_operand.vmem [shape: bf16[32,32], index: 0, kind: input, shape index: {}]   ;;  %s1016_s1 = inlined_call_operand.vmem [shape: s32[2,16,4], index: 1, kind: input, shape index: {}]   ;;  %s1017_s2 = inlined_call_operand.vmem [shape: f32[2,1,16], index: 2, kind: input, shape index: {}]   ;;  %s1018_s3 = inlined_call_operand.vmem [shape: bf16[32,16], index: 3, kind: input, shape index: {}]   ;;  %s1019_s4 = inlined_call_operand.vmem [shape: f32[16,16], index: 4, kind: input, shape index: {}]   ;;  %s1020_s5 = inlined_call_operand.vmem [shape: f32[4,16], index: 5, kind: input, shape index: {}]   ;;  %s1021_s6 = inlined_call_operand.<no memory space> [shape: f32[1], index: 6, kind: input, shape index: {}]   ;;  %s1022_s7 = inlined_call_operand.hbm [shape: f32[2,16], index: 7, kind: output, shape index: {}]  }
   0x1   :  { %v793_v0 = vld [vmem:[%s1018_s3] sm:$0xff]   ;;  %781 = vset.pattern.permute.xlu1 %v835_v1  ;;  %v794_v3 = vld [vmem:[%s1018_s3 + $0x8] sm:$0xff]   ;;  %780 = vset.pattern.permute.xlu0 %v836_v6 }
   0x2   :  { %v122_v2 = vld [vmem:[%s1016_s1] sm:$0xff]  ;;  %722 = vmatprep.subr.bf16.mxu0 %v793_v0  ;;  %v123_v4 = vld [vmem:[%s1016_s1 + $0x8] sm:$0xff]  ;;  %730 = vmatprep.subr.bf16.mxu1 %v837_v7 }
   0x3   :  { %155 = vperm.xlu1 %781, %v122_v2   ;;  %723 = vmatpush3.bf16.msra.mxu0 %v793_v0  ;;  %v795_v5 = vld [vmem:[%s1015_s0] sm:$0xff]   ;;  %v796_v8 = vld [vmem:[%s1015_s0 + $0x8] sm:$0xff]  }
   0x4   :  { %724 = vmatprep.subr.bf16.mxu0 %v794_v3  ;;  %127 = vperm.xlu0 %780, %v122_v2  }
   0x5   :  { %726 = vmatprep.mubr.msk.bf16.mxu0 %vm64_vm0, %v795_v5 }
   0x7   :  { %158 = vperm.xlu1 %781, %v123_v4  }
   0x8   :  { %13 = vsyncpa [#allocation4], 0  ;;  %725 = vmatpush3.bf16.msra.mxu0 %v794_v3  ;;  %130 = vperm.xlu0 %780, %v123_v4   ;;  %v838_v9 = vmov 2   ;;  %v839_v10 = vmov 3   ;;  %v124_v11 = vld [vmem:[%s1016_s1 + $0x10] sm:$0xff]  ;;  %v125_v12 = vld [vmem:[%s1016_s1 + $0x18] sm:$0xff]  ;;  %v120_v27 = vlaneseq }
   0x9   :  { %vm238_vm1 = vcmp.ge.s32.totalorder %v122_v2, 0  ;;  %vm250_vm2 = vcmask 31744   ;;  %vm240_vm3 = vcmp.ge.s32.totalorder %v124_v11, 0  ;;  %vm241_vm4 = vcmp.ge.s32.totalorder %v125_v12, 0  ;;  %v670_v51 = vld [vmem:[%s1020_s5] ss:$0 sm:$0xff] }
   0xa   :  { %v693_v13 = vsel %vm238_vm1, 1.0, %v837_v7  ;;  %v695_v15 = vsel %vm240_vm3, 1.0, %v837_v7  ;;  %v696_v17 = vsel %vm241_vm4, 1.0, %v837_v7  ;;  %vm239_vm5 = vcmp.ge.s32.totalorder %v123_v4, 0  ;;  %s364_s18 = ssub.f32 1.0, %s1021_s6  ;;  %s842_s9 = smov [#allocation3]  }
   0xb   :  { %727 = vmatmul.mubr.msk.bf16.vlgmr.msra.gmra.mrb[0].mxu0 %vm64_vm0, %v796_v8  ;;  %783 = vset.pattern.permute.xlu1 %v838_v9  ;;  %v251_v14 = vsel %vm250_vm2, %v693_v13, 0.0  ;;  %v257_v16 = vsel %vm250_vm2, %v695_v15, 0.0  ;;  %v260_v18 = vsel %vm250_vm2, %v696_v17, 0.0  ;;  %v694_v19 = vsel %vm239_vm5, 1.0, %v837_v7  ;;  %s662_s10 = sshll.u32 %s842_s9, 4  ;;  %s663_s10 = int_to_ptr.vmem [resolvable:$true] %s662_s10 }
   0xc   :  { %186 = vperm.xlu1 %783, %v123_v4   ;;  %782 = vset.pattern.permute.xlu0 %v838_v9  ;;  %v254_v20 = vsel %vm250_vm2, %v694_v19, 0.0  ;;  %vm840_vm6 = vmmov 0   ;;  %v916_v30 = vand.u32 127, %v120_v27  ;;  %v841_v19 = vmov 0.0|0.0   ;;  %s811_s3 = scalar_lea.vmem %s663_s10, 32  ;;  %p816_p1 = scmp.lt.s32.totalorder %s663_s10, %s663_s10 }
   0xd   :  { %183 = vperm.xlu0 %782, %v122_v2   ;;  %732 = vmatprep.mubr.msk.bf16.mxu1 %vm840_vm6, %v837_v7  ;;  %p812_p0 = scmp.ne.s32.totalorder %s663_s10, %s811_s3  ;;  %p817_p2 = scmp.lt.s32.totalorder %s811_s3, %s811_s3 }
   0xe   :  { %746 = vmatprep.mubr.msk.f32.mxu0 %vm840_vm6, %v837_v7  ;;  %763 = vmatprep.subr.bf16.mxu0 %v841_v19 }
   0xf   :  { %p818_p3 = por %p817_p2, %p816_p1 }
  0x10   :  { %784 = vset.pattern.permute.xlu1 %v839_v10 }
  0x11   :  { %211 = vperm.xlu1 %784, %v122_v2   ;;  %785 = vset.pattern.permute.xlu0 %v839_v10  ;;  %p819_p4 = pnand %p818_p3, %p812_p0 }
  0x12   :  { %214 = vperm.xlu0 %785, %v123_v4  }
  0x15   :  { %786 = vset.pattern.permute.xlu1 %v836_v6 }
  0x16   :  { %133 = vperm.xlu1 %786, %v124_v11   ;;  %787 = vset.pattern.permute.xlu0 %v835_v1 }
  0x17   :  { %161 = vperm.xlu0 %787, %v124_v11  }
  0x1a   :  { %136 = vperm.xlu1 %786, %v125_v12  }
  0x1b   :  { %790 = vset.pattern.permute.xlu0 %v838_v9 }
  0x1c   :  { %192 = vperm.xlu0 %790, %v125_v12  }
  0x1e   :  { %788 = vset.pattern.permute.xlu1 %v835_v1 }
  0x1f   :  { %164 = vperm.xlu1 %788, %v125_v12  }
  0x20   :  { %792 = vset.pattern.permute.xlu0 %v839_v10 }
  0x23   :  { %789 = vset.pattern.permute.xlu1 %v838_v9 }
  0x24   :  { %189 = vperm.xlu1 %789, %v124_v11  }
  0x28   :  { %791 = vset.pattern.permute.xlu1 %v839_v10 }
  0x29   :  { %217 = vperm.xlu1 %791, %v124_v11  }
  0x2d   :  { %220 = vperm.xlu1 %791, %v125_v12  }
  0x3b   :  { %252 = vadd.xlane.f32.xlu0 %v251_v14 }
  0x3f   :  { %258 = vadd.xlane.f32.xlu0 %v257_v16 }
  0x43   :  { %261 = vadd.xlane.f32.xlu0 %v260_v18 }
  0x51   :  { %255 = vadd.xlane.f32.xlu1 %v254_v20 }
  0x82   :  { %v156_v21 = vpop.permute.xlu1 %155 }
  0x83   :  { %v128_v25 = vpop.permute.xlu0 %127  ;;  %vm166_vm9 = vcmp.eq.s32.totalorder %v156_v21, %v916_v30 }
  0x84   :  { %vm138_vm7 = vcmp.eq.s32.totalorder %v128_v25, %v916_v30  ;;  %v681_v38 = vsel %vm166_vm9, 1.0, %v837_v7 }
  0x85   :  { %v677_v33 = vsel %vm138_vm7, 1.0, %v837_v7 }
  0x86   :  { %v159_v22 = vpop.permute.xlu1 %158 }
  0x87   :  { %v131_v28 = vpop.permute.xlu0 %130  ;;  %vm167_vm10 = vcmp.eq.s32.totalorder %v159_v22, %v916_v30 }
  0x88   :  { %vm139_vm8 = vcmp.eq.s32.totalorder %v131_v28, %v916_v30  ;;  %v682_v39 = vsel %vm167_vm10, 1.0, %v837_v7 }
  0x89   :  { %v678_v34 = vsel %vm139_vm8, 1.0, %v837_v7  ;;  %v178_v40 = vpack.c.bf16 %v682_v39, %v681_v38  ;;  %vm265_vm8 = vcmask 130048  }
  0x8a   :  { %v150_v35 = vpack.c.bf16 %v678_v34, %v677_v33 }
  0x8b   :  { %v187_v23 = vpop.permute.xlu1 %186 }
  0x8c   :  { %v184_v31 = vpop.permute.xlu0 %183  ;;  %vm195_vm11 = vcmp.eq.s32.totalorder %v187_v23, %v916_v30  ;;  %v152_v41 = vadd.bf16 0, %v150_v35 }
  0x8d   :  { %vm194_vm12 = vcmp.eq.s32.totalorder %v184_v31, %v916_v30  ;;  %v686_v43 = vsel %vm195_vm11, 1.0, %v837_v7  ;;  %v359_v31 = vstv %s1021_s6 }
  0x8e   :  { %v685_v44 = vsel %vm194_vm12, 1.0, %v837_v7  ;;  %v180_v48 = vadd.bf16 %v178_v40, %v152_v41 }
  0x8f   :  { %v206_v49 = vpack.c.bf16 %v686_v43, %v685_v44 }
  0x90   :  { %v212_v24 = vpop.permute.xlu1 %211 }
  0x91   :  { %v215_v36 = vpop.permute.xlu0 %214  ;;  %vm222_vm15 = vcmp.eq.s32.totalorder %v212_v24, %v916_v30  ;;  %v208_v63 = vadd.bf16 %v206_v49, %v180_v48 }
  0x92   :  { %vm223_vm0 = vcmp.eq.s32.totalorder %v215_v36, %v916_v30  ;;  %v689_v54 = vsel %vm222_vm15, 1.0, %v837_v7 }
  0x93   :  { %v690_v55 = vsel %vm223_vm0, 1.0, %v837_v7 }
  0x94   :  { %v234_v3 = vpack.c.bf16 %v690_v55, %v689_v54 }
  0x95   :  { %v134_v26 = vpop.permute.xlu1 %133 }
  0x96   :  { %vm140_vm13 = vcmp.eq.s32.totalorder %v134_v26, %v916_v30  ;;  %v162_v42 = vpop.permute.xlu0 %161  ;;  %v236_v11 = vadd.bf16 %v234_v3, %v208_v63 }
  0x97   :  { %v679_v45 = vsel %vm140_vm13, 1.0, %v837_v7  ;;  %vm168_vm2 = vcmp.eq.s32.totalorder %v162_v42, %v916_v30  ;;  %vm628_vm13 = vcmask 123904  }
  0x98   :  { %v683_v57 = vsel %vm168_vm2, 1.0, %v837_v7 }
  0x99   :  { %v137_v29 = vpop.permute.xlu1 %136 }
  0x9a   :  { %vm141_vm14 = vcmp.eq.s32.totalorder %v137_v29, %v916_v30  ;;  %v369_v29 = vstv %s364_s18 }
  0x9b   :  { %v680_v46 = vsel %vm141_vm14, 1.0, %v837_v7  ;;  %v193_v58 = vpop.permute.xlu0 %192 }
  0x9c   :  { %v151_v52 = vpack.c.bf16 %v680_v46, %v679_v45  ;;  %vm197_vm4 = vcmp.eq.s32.totalorder %v193_v58, %v916_v30 }
  0x9d   :  { %v688_v9 = vsel %vm197_vm4, 1.0, %v837_v7 }
  0x9e   :  { %v165_v32 = vpop.permute.xlu1 %164  ;;  %v153_v4 = vadd.bf16 0, %v151_v52 }
  0x9f   :  { %vm169_vm1 = vcmp.eq.s32.totalorder %v165_v32, %v916_v30 }
  0xa0   :  { %v684_v56 = vsel %vm169_vm1, 1.0, %v837_v7 }
  0xa1   :  { %v179_v5 = vpack.c.bf16 %v684_v56, %v683_v57 }
  0xa3   :  { %v190_v37 = vpop.permute.xlu1 %189  ;;  %v181_v12 = vadd.bf16 %v179_v5, %v153_v4 }
  0xa4   :  { %vm196_vm3 = vcmp.eq.s32.totalorder %v190_v37, %v916_v30 }
  0xa5   :  { %v687_v8 = vsel %vm196_vm3, 1.0, %v837_v7 }
  0xa6   :  { %v207_v13 = vpack.c.bf16 %v688_v9, %v687_v8  ;;  %v545_v8 = vld [vmem:[%s1019_s4 + $0x8] sm:$0xff] }
  0xa8   :  { %v218_v47 = vpop.permute.xlu1 %217  ;;  %v209_v16 = vadd.bf16 %v207_v13, %v181_v12 }
  0xa9   :  { %vm224_vm5 = vcmp.eq.s32.totalorder %v218_v47, %v916_v30 }
  0xaa   :  { %v691_v14 = vsel %vm224_vm5, 1.0, %v837_v7 }
  0xac   :  { %v221_v0 = vpop.permute.xlu1 %220 }
  0xad   :  { %vm225_vm7 = vcmp.eq.s32.totalorder %v221_v0, %v916_v30 }
  0xae   :  { %v692_v15 = vsel %vm225_vm7, 1.0, %v837_v7 }
  0xaf   :  { %v235_v17 = vpack.c.bf16 %v692_v15, %v691_v14 }
  0xb1   :  { %v237_v18 = vadd.bf16 %v235_v17, %v209_v16  ;;  %v701_v17 = vld [vmem:[%s1020_s5 + $0x1] ss:$0 sm:$0xff] }
  0xc8   :  { %v253_v20 = vpop.xlane.xlu0 %252 }
  0xc9   :  { %v365_v21 = vmax.f32 %v253_v20, 1.0  ;;  %vm355_vm9 = vcmp.gt.f32.partialorder %v253_v20, 0.0 }
  0xca   :  { %v360_v33 = vsel %vm355_vm9, %v359_v31, 1.0 }
  0xcb   :  { %797 = vrcp.f32 %v365_v21 }
  0xcc   :  { %v259_v24 = vpop.xlane.xlu0 %258 }
  0xcd   :  { %v367_v25 = vmax.f32 %v259_v24, 1.0  ;;  %vm357_vm11 = vcmp.gt.f32.partialorder %v259_v24, 0.0 }
  0xd0   :  { %v262_v26 = vpop.xlane.xlu0 %261 }
  0xd1   :  { %v368_v27 = vmax.f32 %v262_v26, 1.0  ;;  %vm358_vm12 = vcmp.gt.f32.partialorder %v262_v26, 0.0 }
  0xd2   :  { %v363_v54 = vsel %vm358_vm12, %v359_v31, 1.0 }
  0xd5   :  { %v798_v28 = vpop.eup %797 }
  0xd6   :  { %v371_v32 = vmul.f32 %v798_v28, %v369_v29 }
  0xd8   :  { %v378_v37 = vsel %vm355_vm9, %v371_v32, 0.0 }
  0xde   :  { %v728_v50 = vpop.f32.mrb[0].mxu0  ;;  %v256_v22 = vpop.xlane.xlu1 %255 }
  0xdf   :  { %v105_v53 = vpop.f32.mrb[1].mxu0  ;;  %v947_v60 = vadd.f32 %v728_v50, %v670_v51  ;;  %v366_v23 = vmax.f32 %v256_v22, 1.0  ;;  %vm356_vm10 = vcmp.gt.f32.partialorder %v256_v22, 0.0 }
  0xe0   :  { %v729_v59 = vpop.f32.mrb[2].mxu0  ;;  %v106_v1 = vadd.f32 %v670_v51, %v105_v53  ;;  %v361_v35 = vsel %vm356_vm10, %v359_v31, 1.0 }
  0xe1   :  { %v949_v61 = vadd.f32 %v729_v59, %v670_v51  ;;  %v108_v62 = vpop.f32.mrb[3].mxu0  ;;  %799 = vrcp.f32 %v366_v23 }
  0xe2   :  { %v109_v2 = vadd.f32 %v670_v51, %v108_v62  ;;  %801 = vrcp.f32 %v367_v25  ;;  %v382_v39 = vmul.f32 %v360_v33, %v106_v1  ;;  %v362_v51 = vsel %vm357_vm11, %v359_v31, 1.0  ;;  %v394_v62 = vld [vmem:[%s1017_s2] sm:$0x1]  ;;  %v703_v31 = vld [vmem:[%s1020_s5 + $0x2] ss:$0 sm:$0xff] }
  0xe3   :  { %v264_v6 = vpack.c.bf16 %v949_v61, %v947_v60  ;;  %803 = vrcp.f32 %v368_v27  ;;  %v384_v57 = vmul.f32 %v362_v51, %v947_v60  ;;  %v704_v33 = vld [vmem:[%s1020_s5 + $0x3] ss:$0 sm:$0xff] }
  0xe4   :  { %v263_v10 = vpack.c.bf16 %v109_v2, %v106_v1  ;;  %v383_v45 = vmul.f32 %v361_v35, %v109_v2  ;;  %v385_v1 = vmul.f32 %v363_v54, %v949_v61  ;;  %v544_v61 = vld [vmem:[%s1019_s4] sm:$0xff] }
  0xe5   :  { %v770_v9 = vpack.c.bf16 %v545_v8, %v544_v61 }
  0xe6   :  { %731 = vmatpush3.bf16.msra.mxu1 %v263_v10 }
  0xe7   :  { %736 = vmatprep.subr.bf16.mxu1 %v837_v7 }
  0xe9   :  { %733 = vmatmul.mubr.msk.bf16.vlgmr.msra.gmra.mrb[0].mxu1 %vm265_vm8, %v236_v11 }
  0xea   :  { %737 = vmatpush3.bf16.msra.mxu1 %v264_v6  ;;  %738 = vmatprep.mubr.msk.bf16.mxu1 %vm840_vm6, %v837_v7  ;;  %v395_v6 = vld [vmem:[%s1017_s2 + $0x1] sm:$0x1] }
  0xeb   :  { %769 = vmatprep.subr.bf16.mxu1 %v841_v19  ;;  %v800_v30 = vpop.eup %799 }
  0xec   :  { %v373_v34 = vmul.f32 %v800_v30, %v369_v29  ;;  %v802_v38 = vpop.eup %801 }
  0xed   :  { %v804_v44 = vpop.eup %803  ;;  %v375_v49 = vmul.f32 %v802_v38, %v369_v29 }
  0xee   :  { %v379_v43 = vsel %vm356_vm10, %v373_v34, 0.0  ;;  %v377_v52 = vmul.f32 %v804_v44, %v369_v29 }
  0xef   :  { %v380_v56 = vsel %vm357_vm11, %v375_v49, 0.0 }
  0xf0   :  { %v381_v0 = vsel %vm358_vm12, %v377_v52, 0.0 }
  0xf1   :  { %739 = vmatmul.mubr.msk.bf16.vlgmr.msra.gmra.mrb[4].mxu1 %vm265_vm8, %v237_v18 }
  0xf2   :  { %760 = vmatprep.mubr.msk.f32.mxu1 %vm840_vm6, %v837_v7  ;;  %771 = vmatpush3.bf16.msra.mxu1 %v770_v9 }
 0x1bc   :  { %v303_v36 = vpop.f32.mrb[0].mxu1 }
 0x1bd   :  { %v386_v40 = vmul.f32 %v378_v37, %v303_v36  ;;  %v734_v41 = vpop.f32.mrb[1].mxu1 }
 0x1be   :  { %v306_v42 = vpop.f32.mrb[2].mxu1 }
 0x1bf   :  { %v390_v46 = vadd.f32 %v386_v40, %v382_v39  ;;  %v387_v47 = vmul.f32 %v379_v43, %v306_v42  ;;  %v735_v48 = vpop.f32.mrb[3].mxu1 }
 0x1c1   :  { %v391_v50 = vadd.f32 %v387_v47, %v383_v45 }
 0x1c3   :  { %v764_v53 = vpack.c.bf16 %v391_v50, %v390_v46 }
 0x1c4   :  { %v347_v55 = vpop.f32.mrb[4].mxu1 }
 0x1c5   :  { %v388_v58 = vmul.f32 %v380_v56, %v347_v55  ;;  %v740_v59 = vpop.f32.mrb[5].mxu1  ;;  %765 = vmatpush3.bf16.msra.mxu0 %v764_v53 }
 0x1c6   :  { %v350_v63 = vpop.f32.mrb[6].mxu1  ;;  %766 = vmatprep.subr.bf16.mxu0 %v841_v19 }
 0x1c7   :  { %v392_v2 = vadd.f32 %v388_v58, %v384_v57  ;;  %v389_v3 = vmul.f32 %v381_v0, %v350_v63  ;;  %v741_v4 = vpop.f32.mrb[7].mxu1 }
 0x1c8   :  { %747 = vmatmul.mubr.msk.f32.vlgmr.msra.gmra.mrb[4].mxu0 %vm265_vm8, %v394_v62 }
 0x1c9   :  { %v393_v5 = vadd.f32 %v389_v3, %v385_v1  ;;  %753 = vmatprep.mubr.msk.f32.mxu0 %vm840_vm6, %v837_v7  ;;  %vm554_vm6 = vcmask 1041409  }
 0x1cb   :  { %v767_v60 = vpack.c.bf16 %v393_v5, %v392_v2 }
 0x1cd   :  { %768 = vmatpush3.bf16.msra.mxu0 %v767_v60 }
 0x1d0   :  { %754 = vmatmul.mubr.msk.f32.vlgmr.msra.gmra.mrb[6].mxu0 %vm265_vm8, %v395_v6 }
 0x29b   :  { %v465_v10 = vpop.f32.mrb[4].mxu0 }
 0x29c   :  { %v748_v7 = vpop.f32.mrb[5].mxu0 }
 0x2a3   :  { %v538_v11 = vpop.f32.mrb[6].mxu0 }
 0x2a4   :  { %805 = vtanh.f32 %v538_v11  ;;  %v755_v12 = vpop.f32.mrb[7].mxu0 }
 0x2a5   :  { %807 = vtanh.f32 %v465_v10 }
 0x2ae   :  { %v806_v13 = vpop.eup %805 }
 0x2af   :  { %v553_v14 = vrot.slane %v806_v13, 7  ;;  %v808_v15 = vpop.eup %807 }
 0x2b1   :  { %v555_v16 = vsel %vm554_vm6, %v553_v14, %v808_v15 }
 0x2b2   :  { %761 = vmatmul.mubr.msk.f32.vlgmr.msra.gmra.mrb[8].mxu1 %vm265_vm8, %v555_v16 }
 0x385   :  { %v624_v18 = vpop.f32.mrb[8].mxu1 }
 0x386   :  { %v625_v19 = vadd.f32 %v701_v17, %v624_v18  ;;  %v762_v20 = vpop.f32.mrb[9].mxu1 }
 0x388   :  { %v629_v21 = vsel %vm628_vm13, %v625_v19, 0.0 }
 0x389   :  { %630 = vadd.xlane.f32.xlu1 %v629_v21 }
 0x416   :  { %v631_v22 = vpop.xlane.xlu1 %630 }
 0x417   :  { %v633_v23 = vmul.f32 0.0625, %v631_v22 }
 0x419   :  { %v634_v24 = vsub.f32 %v625_v19, %v633_v23 }
 0x41b   :  { %v635_v25 = vmul.f32 %v634_v24, %v634_v24 }
 0x41d   :  { %v636_v26 = vsel %vm628_vm13, %v635_v25, 0.0 }
 0x41e   :  { %637 = vadd.xlane.f32.xlu0 %v636_v26 }
 0x4ab   :  { %v638_v27 = vpop.xlane.xlu0 %637 }
 0x4ac   :  { %v639_v28 = vmul.f32 0.0625, %v638_v27 }
 0x4ae   :  { %v640_v29 = vadd.f32 1e-05, %v639_v28 }
 0x4b0   :  { %809 = vrsqrt.f32 %v640_v29 }
 0x4ba   :  { %v810_v30 = vpop.eup %809 }
 0x4bb   :  { %v642_v32 = vmul.f32 %v810_v30, %v634_v24 }
 0x4bd   :  { %v648_v34 = vmul.f32 %v703_v31, %v642_v32 }
 0x4bf   :  { %v654_v35 = vadd.f32 %v704_v33, %v648_v34 }
 0x4c1   :  { %655 = vst.msk [vmem:[#allocation3] sm:$0x3] %vm628_vm13, %v654_v35 }
 0x4c2   :  { %822 = shalt.err (!%p819_p4)
}
 0x4c3   :  { %s823_s13 = scalar_lea.hbm %s1022_s7, 32 }
 0x4c4   :  { %p824_p5 = scmp.ne.s32.totalorder %s1022_s7, %s823_s13  ;;  %p827_p6 = scmp.lt.u32.totalorder %s823_s13, %s1022_s7 }
 0x4c6   :  { %p829_p7 = pnand %p827_p6, %p824_p5 }
 0x4c8   :  { %832 = shalt.err (!%p829_p7)
}
 0x4c9   :  { %665 = dma.vmem_to_hbm [thread:$0]  %s663_s10, 32, %s1022_s7, [#allocation4]  }
 0x4ca   :  { %833 = dma.done.wait [#allocation4], 32  }
 0x4cb   :  { %834 = vsyncadd [#allocation4], 4294967264 }
 0x4cc   :  { %669 = vsyncpa [#allocation4], 1 }

</bundles_post_ra>
